<compile_context>
chip_gen: v5e
topology: v5e:2x2
jax: 0.10.0
libtpu: 0.0.40
codegen_flags: <defaults>
</compile_context>

<pallas_src>
import functools

import jax
import jax.numpy as jnp
from jax.experimental import pallas as pl
from jax.experimental.pallas import tpu as pltpu


def _se_kernel(x_ref, w1t_ref, b1_ref, w2t_ref, b2_ref, o_ref, *, inv_hw):
    # x_ref: (Bt, HW, C) block in the input dtype (channels-last).
    x = x_ref[...]

    # ---- squeeze: AdaptiveAvgPool2d(1) == mean over spatial dims ----
    # Accumulate in f32 and multiply by the static 1/HW (no per-step divide).
    pooled = jnp.sum(x.astype(jnp.float32), axis=1) * inv_hw          # (Bt, C)

    # ---- excitation: Linear(C -> Cr) + ReLU (weights pre-transposed) ----
    h = jnp.dot(pooled, w1t_ref[...], preferred_element_type=jnp.float32)
    h = jnp.maximum(h + b1_ref[...], 0.0)                             # (Bt, Cr)

    # ---- excitation: Linear(Cr -> C) + Sigmoid ----
    s = jnp.dot(h, w2t_ref[...], preferred_element_type=jnp.float32)
    s = jax.nn.sigmoid(s + b2_ref[...])                               # (Bt, C)

    # ---- scale: x * s, broadcast over the spatial (sublane) axis ----
    o_ref[...] = x * s[:, None, :].astype(o_ref.dtype)


def _largest_batch_tile(B, bytes_per_elem, tile_budget_bytes):
    """Largest Bt (divisor of B) whose double-buffered in+out tiles fit."""
    bt = int(max(1, tile_budget_bytes // (4 * bytes_per_elem)))  # 2 bufs * (in+out)
    bt = min(bt, B)
    if B >= 2:
        bt = min(bt, (B + 1) // 2)   # keep >= 2 grid steps for v7x megacore
    while B % bt != 0:
        bt -= 1
    return bt


def se_block(x_nchw, w1, b1, w2, b2):
    """SEBlock forward. x_nchw: (B, C, H, W). Returns same shape/dtype."""
    B, C, H, W = x_nchw.shape
    HW = H * W
    Cr = w1.shape[0]
    dtype = x_nchw.dtype
    itemsize = jnp.dtype(dtype).itemsize

    # Channels-last for the kernel: (B, HW, C) -> C sits on lanes.
    x = jnp.transpose(x_nchw.reshape(B, C, HW), (0, 2, 1))

    # Pre-transpose weights; 2-D biases for clean broadcasting.
    w1_t = jnp.transpose(w1)            # (C, Cr)
    w2_t = jnp.transpose(w2)            # (Cr, C)
    b1_2d = b1.reshape(1, Cr)
    b2_2d = b2.reshape(1, C)

    # Tile-size / VMEM budgeting (conservative so it holds on v5e/v6e/v7x).
    tile_budget = 24 * 1024 * 1024
    bytes_per_elem = HW * C * itemsize
    bt = _largest_batch_tile(B, bytes_per_elem, tile_budget)
    grid = (B // bt,)

    weight_bytes = (C * Cr * 2 + C + Cr) * jnp.dtype(w1.dtype).itemsize
    needed_vmem = 4 * bt * bytes_per_elem + 2 * weight_bytes + (2 << 20)
    vmem_limit = int(min(max(32 << 20, needed_vmem), 100 << 20))
    # TODO(synk): feature maps so large that a single (1, HW, C) tile exceeds
    # ~64 MiB of VMEM (v7x) need a two-pass squeeze/scale design with HW tiling.

    cost = pl.CostEstimate(
        flops=int(B * (2 * HW * C + 4 * C * Cr)),
        transcendentals=int(B * C),
        bytes_accessed=int(2 * B * HW * C * itemsize + 2 * weight_bytes),
    )

    kernel = functools.partial(_se_kernel, inv_hw=1.0 / HW)

    out = pl.pallas_call(
        kernel,
        out_shape=jax.ShapeDtypeStruct((B, HW, C), dtype),
        grid_spec=pltpu.PrefetchScalarGridSpec(
            num_scalar_prefetch=0,
            grid=grid,
            in_specs=[
                pl.BlockSpec((bt, HW, C), lambda b: (b, 0, 0)),   # x batch tile
                pl.BlockSpec((C, Cr), lambda b: (0, 0)),          # w1^T
                pl.BlockSpec((1, Cr), lambda b: (0, 0)),          # b1
                pl.BlockSpec((Cr, C), lambda b: (0, 0)),          # w2^T
                pl.BlockSpec((1, C), lambda b: (0, 0)),           # b2
            ],
            out_specs=pl.BlockSpec((bt, HW, C), lambda b: (b, 0, 0)),
        ),
        compiler_params=pltpu.CompilerParams(
            dimension_semantics=("parallel",),
            vmem_limit_bytes=vmem_limit,
        ),
        cost_estimate=cost,
    )(x, w1_t, b1_2d, w2_t, b2_2d)

    # Back to NCHW.
    return jnp.transpose(out, (0, 2, 1)).reshape(B, C, H, W)


if __name__ == "__main__":
    # Small shapes consistent with the module: C divisible by reduction_ratio
    # and a multiple of 128 so channels are lane-dense in the kernel.
    B, C, H, W = 4, 128, 8, 8
    reduction_ratio = 16
    Cr = C // reduction_ratio  # 8

    key = jax.random.PRNGKey(0)
    kx, k1, k2, k3, k4 = jax.random.split(key, 5)

    x = jax.random.normal(kx, (B, C, H, W), dtype=jnp.float32)

    # PyTorch Linear default init: U(-1/sqrt(fan_in), +1/sqrt(fan_in)).
    bound1 = 1.0 / (C ** 0.5)
    w1 = jax.random.uniform(k1, (Cr, C), jnp.float32, -bound1, bound1)
    b1 = jax.random.uniform(k2, (Cr,), jnp.float32, -bound1, bound1)
    bound2 = 1.0 / (Cr ** 0.5)
    w2 = jax.random.uniform(k3, (C, Cr), jnp.float32, -bound2, bound2)
    b2 = jax.random.uniform(k4, (C,), jnp.float32, -bound2, bound2)

    out = jax.block_until_ready(se_block(x, w1, b1, w2, b2))

    # Reference in plain JAX (same math as the PyTorch module).
    y = jnp.mean(x, axis=(2, 3))                      # (B, C)
    h = jnp.maximum(y @ w1.T + b1, 0.0)               # (B, Cr)
    s = jax.nn.sigmoid(h @ w2.T + b2)                 # (B, C)
    ref = x * s[:, :, None, None]

    assert out.shape == (B, C, H, W)
    assert out.dtype == x.dtype
    assert jnp.allclose(out, ref, atol=1e-5, rtol=1e-5)

    print("KERNEL_OK")
</pallas_src>

<mosaic_0001>
module attributes {stable_mosaic.version = 11 : i64} {
  func.func @_se_kernel(%arg0: i32, %arg1: memref<2x64x128xf32, #tpu.memory_space<vmem>>, %arg2: memref<128x8xf32, #tpu.memory_space<vmem>>, %arg3: memref<1x8xf32, #tpu.memory_space<vmem>>, %arg4: memref<8x128xf32, #tpu.memory_space<vmem>>, %arg5: memref<1x128xf32, #tpu.memory_space<vmem>>, %arg6: memref<2x64x128xf32, #tpu.memory_space<vmem>>) attributes {dimension_semantics = [#tpu.dimension_semantics<parallel>], iteration_bounds = array<i64: 2>, scalar_prefetch = 0 : i64, scratch_operands = 0 : i64, tpu.core_type = #tpu.core_type<tc>, window_params = [{transform_indices = @transform_0, window_bounds = array<i64: 2, 64, 128>}, {pipeline_mode = #tpu.pipeline_mode<synchronous>, transform_indices = @transform_1, window_bounds = array<i64: 128, 8>}, {pipeline_mode = #tpu.pipeline_mode<synchronous>, transform_indices = @transform_2, window_bounds = array<i64: 1, 8>}, {pipeline_mode = #tpu.pipeline_mode<synchronous>, transform_indices = @transform_3, window_bounds = array<i64: 8, 128>}, {pipeline_mode = #tpu.pipeline_mode<synchronous>, transform_indices = @transform_4, window_bounds = array<i64: 1, 128>}, {transform_indices = @transform_5, window_bounds = array<i64: 2, 64, 128>}]} {
    %c0 = arith.constant 0 : index
    %c0_0 = arith.constant 0 : index
    %c0_1 = arith.constant 0 : index
    %0 = vector.load %arg1[%c0, %c0_0, %c0_1] : memref<2x64x128xf32, #tpu.memory_space<vmem>>, vector<2x64x128xf32>
    %cst = arith.constant dense<0.000000e+00> : vector<2x128xf32>
    %1 = vector.multi_reduction <add>, %0, %cst [1] : vector<2x64x128xf32> to vector<2x128xf32>
    %cst_2 = arith.constant 1.562500e-02 : f32
    %2 = vector.broadcast %cst_2 : f32 to vector<2x128xf32>
    %3 = arith.mulf %1, %2 : vector<2x128xf32>
    %c0_3 = arith.constant 0 : index
    %c0_4 = arith.constant 0 : index
    %4 = vector.load %arg2[%c0_3, %c0_4] : memref<128x8xf32, #tpu.memory_space<vmem>>, vector<128x8xf32>
    %cst_5 = arith.constant dense<0.000000e+00> : vector<2x8xf32>
    %5 = tpu.matmul %3, %4, %cst_5 {dimension_numbers = #tpu.dot_dimension_numbers<[1], [0], [0], [1], [0, 0, 1, 1], [], []>} : vector<2x128xf32>, vector<128x8xf32>, vector<2x8xf32> -> vector<2x8xf32>
    %c0_6 = arith.constant 0 : index
    %c0_7 = arith.constant 0 : index
    %6 = vector.load %arg3[%c0_6, %c0_7] : memref<1x8xf32, #tpu.memory_space<vmem>>, vector<1x8xf32>
    %7 = vector.broadcast %6 : vector<1x8xf32> to vector<2x8xf32>
    %8 = arith.addf %5, %7 : vector<2x8xf32>
    %cst_8 = arith.constant 0.000000e+00 : f32
    %9 = vector.broadcast %cst_8 : f32 to vector<2x8xf32>
    %10 = arith.maximumf %8, %9 : vector<2x8xf32>
    %c0_9 = arith.constant 0 : index
    %c0_10 = arith.constant 0 : index
    %11 = vector.load %arg4[%c0_9, %c0_10] : memref<8x128xf32, #tpu.memory_space<vmem>>, vector<8x128xf32>
    %cst_11 = arith.constant dense<0.000000e+00> : vector<2x128xf32>
    %12 = tpu.matmul %10, %11, %cst_11 {dimension_numbers = #tpu.dot_dimension_numbers<[1], [0], [0], [1], [0, 0, 1, 1], [], []>} : vector<2x8xf32>, vector<8x128xf32>, vector<2x128xf32> -> vector<2x128xf32>
    %c0_12 = arith.constant 0 : index
    %c0_13 = arith.constant 0 : index
    %13 = vector.load %arg5[%c0_12, %c0_13] : memref<1x128xf32, #tpu.memory_space<vmem>>, vector<1x128xf32>
    %14 = vector.broadcast %13 : vector<1x128xf32> to vector<2x128xf32>
    %15 = arith.addf %12, %14 : vector<2x128xf32>
    %16 = arith.negf %15 : vector<2x128xf32>
    %17 = math.exp %16 : vector<2x128xf32>
    %cst_14 = arith.constant 1.000000e+00 : f32
    %18 = vector.broadcast %cst_14 : f32 to vector<2x128xf32>
    %19 = arith.addf %18, %17 : vector<2x128xf32>
    %20 = arith.divf %18, %19 : vector<2x128xf32>
    %21 = vector.shape_cast %20 : vector<2x128xf32> to vector<2x1x128xf32>
    %22 = vector.broadcast %21 : vector<2x1x128xf32> to vector<2x64x128xf32>
    %23 = arith.mulf %0, %22 : vector<2x64x128xf32>
    %c0_15 = arith.constant 0 : index
    %c0_16 = arith.constant 0 : index
    %c0_17 = arith.constant 0 : index
    %24 = vector.load %arg6[%c0_15, %c0_16, %c0_17] : memref<2x64x128xf32, #tpu.memory_space<vmem>>, vector<2x64x128xf32>
    tpu.vector_store %arg6[%c0_15, %c0_16, %c0_17], %23 {strides = array<i32>} : memref<2x64x128xf32, #tpu.memory_space<vmem>>, vector<2x64x128xf32>,
    return
  }
  func.func @transform_0(%arg0: i32) -> (i32, i32, i32) {
    %c0_i32 = arith.constant 0 : i32
    %c0_i32_0 = arith.constant 0 : i32
    %c0_i32_1 = arith.constant 0 : i32
    return %arg0, %c0_i32, %c0_i32_0 : i32, i32, i32
  }
  func.func @transform_1(%arg0: i32) -> (i32, i32) {
    %c0_i32 = arith.constant 0 : i32
    %c0_i32_0 = arith.constant 0 : i32
    %c0_i32_1 = arith.constant 0 : i32
    return %c0_i32, %c0_i32_0 : i32, i32
  }
  func.func @transform_2(%arg0: i32) -> (i32, i32) {
    %c0_i32 = arith.constant 0 : i32
    %c0_i32_0 = arith.constant 0 : i32
    %c0_i32_1 = arith.constant 0 : i32
    return %c0_i32, %c0_i32_0 : i32, i32
  }
  func.func @transform_3(%arg0: i32) -> (i32, i32) {
    %c0_i32 = arith.constant 0 : i32
    %c0_i32_0 = arith.constant 0 : i32
    %c0_i32_1 = arith.constant 0 : i32
    return %c0_i32, %c0_i32_0 : i32, i32
  }
  func.func @transform_4(%arg0: i32) -> (i32, i32) {
    %c0_i32 = arith.constant 0 : i32
    %c0_i32_0 = arith.constant 0 : i32
    %c0_i32_1 = arith.constant 0 : i32
    return %c0_i32, %c0_i32_0 : i32, i32
  }
  func.func @transform_5(%arg0: i32) -> (i32, i32, i32) {
    %c0_i32 = arith.constant 0 : i32
    %c0_i32_0 = arith.constant 0 : i32
    %c0_i32_1 = arith.constant 0 : i32
    return %arg0, %c0_i32, %c0_i32_0 : i32, i32, i32
  }
}

</mosaic_0001>

<bundles_post_ra>
// kernel: tpu_custom_call.1
= control target key start
LH: loop header
LB: loop body
LE: loop exit
PB: predicated region body
PF: predicated region fallthrough
CT: control target
= control target key end

     0   :  { %10 = vsyncpa [#allocation3], 0  ;;  %s1013_s0 = inlined_call_operand.hbm [shape: f32[4,64,128], index: 0, kind: input, shape index: {}]   ;;  %s1014_s1 = inlined_call_operand.vmem [shape: f32[128,8], index: 1, kind: input, shape index: {}]   ;;  %s1015_s2 = inlined_call_operand.vmem [shape: f32[1,8], index: 2, kind: input, shape index: {}]   ;;  %s1016_s3 = inlined_call_operand.vmem [shape: f32[8,128], index: 3, kind: input, shape index: {}]   ;;  %s1017_s4 = inlined_call_operand.vmem [shape: f32[1,128], index: 4, kind: input, shape index: {}]   ;;  %s1018_s5 = inlined_call_operand.hbm [shape: f32[4,64,128], index: 5, kind: output, shape index: {}]  }
   0x1   :  { %12 = vsyncpa [#allocation3 + $0x1], 0 }
   0x2   :  { %13 = vsyncpa [#allocation4], 0 }
   0x3   :  { %15 = vsyncpa [#allocation4 + $0x1], 0  ;;  %s724_s18 = smov 0   ;;  %s726_s19 = smov 0  }
   0x4   :  { %s728_s20 = smov 0   ;;  %s730_s21 = smov 0  }
   0x5 LB: > { %s745_s22 = sadd.s32 4294967295, %s688_s21   ;;  %s514_s23 = sadd.s32 4294967294, %s688_s21   ;;  %s688_s21 = sphi %s730_s21, %s1028_s21   ;;  %s684_s20 = sphi %s728_s20, %s1027_s20   ;;  %s680_s19 = sphi %s726_s19, %s1026_s19   ;;  %s676_s18 = sphi %s724_s18, %s1025_s18  }
   0x6   : > { %s749_s24 = sadd.s32 1, %s688_s21   ;;  %s28_s25 = sadd.s32 1, %s684_s20 }
   0x7   : > { %s25_s26 = ssub.s32 %s688_s21, %s749_s24  ;;  %p35_p0 = scmp.ne.s32.totalorder %s684_s20, %s680_s19 }
   0x8   : > { %p26_p1 = scmp.eq.s32.totalorder %s25_s26, 0  ;;  %p36_p2 = scmp.eq.s32.totalorder %s688_s21, 0 }
   0x9   : > { %p41_p3 = scmp.ne.s32.totalorder %s680_s19, %s676_s18  ;;  %p42_p4 = scmp.eq.s32.totalorder %s745_s22, 0 }
   0xa   : > { %s761_s27 = scalar_select %p26_p1, %s684_s20, %s28_s25  }
   0xb   : > { %p763_p5 = por %p36_p2, %p35_p0  ;;  %p767_p6 = por %p42_p4, %p41_p3 }
   0xc   : > { %p149_p7 = scmp.eq.s32.totalorder %s745_s22, 1  ;;  %p155_p8 = scmp.eq.s32.totalorder %s514_s23, 1 }
   0xd   : > { %p548_p10 = scmp.lt.s32.totalorder %s688_s21, 2  ;;  %s187_s7 = sand.u32 1, %s684_s20  }
   0xe   : > { %p774_p11 = por %p149_p7, %p35_p0  ;;  %p778_p12 = por %p155_p8, %p41_p3 }
   0xf   : > { %s533_s8 = sshll.u32 %s688_s21, 7  ;;  %s517_s9 = sshll.u32 %s187_s7, 7 }
  0x10   : > { %s197_s12 = scalar_lea.hbm %s1013_s0, %s533_s8  ;;  %s191_s14 = scalar_lea.vmem [#allocation2], %s517_s9 }
  0x11   : > { %s198_s13 = sshll.u32 %s197_s12, 4  ;;  %s200_s15 = sshll.u32 %s191_s14, 4  ;;  %s199_s13 = int_to_ptr.hbm [resolvable:$true] %s198_s13  ;;  %s201_s15 = int_to_ptr.vmem [resolvable:$true] %s200_s15 }
  0x12   : > { %p789_p13 = pnand %p548_p10, %p763_p5  ;;  %p521_p0 = scmp.ge.s32.totalorder %s688_s21, 1 }
  0x13   : > { %p208_p1 = scmp.lt.s32.totalorder %s688_s21, 3  ;;  %s188_s17 = scalar_lea.sflag [#allocation3], %s187_s7 }
  0x14   : > { %s592_s23 = sshra.s32 %s199_s13, 4  ;;  %p596_p3 = pneg %p789_p13  ;;  %s593_s23 = int_to_ptr.hbm [resolvable:$true] %s592_s23 }
  0x15   : > { %s594_s25 = scalar_lea.hbm %s593_s23, 128  ;;  %s599_s28 = scalar_lea.hbm %s1013_s0, 256 }
  0x16   : > { %p595_p2 = scmp.ne.s32.totalorder %s593_s23, %s594_s25  ;;  %p600_p5 = scmp.lt.s32.totalorder %s593_s23, %s1013_s0 }
  0x17   : > { %p601_p8 = scmp.lt.s32.totalorder %s599_s28, %s594_s25 }
  0x18   : > { %p597_p4 = pnand %p596_p3, %p595_p2 }
  0x19   : > { %p602_p10 = por %p601_p8, %p600_p5 }
  0x1a   : > { %p598_p7 = pneg %p597_p4 }
  0x1c   : > { %p603_p9 = pnand %p602_p10, %p598_p7 }
  0x1e   : > { %606 = shalt.err (!%p603_p9)
}
  0x1f   : > { %s690_s7 = smov 128   ;;  %s691_s11 = smov 8  }
  0x20   : > { %543 = dma.hbm_to_vmem [thread:$0]  (!%p789_p13), %s199_s13, 2048, %s201_s15, %s188_s17, %s690_s7, %s690_s7, %s691_s11  }
  0x21   : > { %p209_p2 = pnand %p521_p0, %p208_p1 }
  0x22   : > { %s810_s12 = sand.u32 (!%p209_p2), 1, %s680_s19  }
  0x23   : > { %212 = sbr.rel (%p209_p2) target bundleno = 384 (0x180), region = 40  ;;  %s522_s14 = sshll.u32 (!%p209_p2), %s810_s12, 7 }
  0x24   : > { %s215_s23 = scalar_lea.sflag (!%p209_p2), [#allocation3], %s810_s12  ;;  %s816_s25 = scalar_lea.vmem (!%p209_p2), [#allocation2], %s522_s14 }
  0x28   : > { %667 = dma.done.wait (%p767_p6), %s215_s23, 2048  }
  0x29   : > { %669 = vsyncadd (%p767_p6), %s215_s23, 4294965248  ;;  %v307_v0 = vld [vmem:[%s1014_s1 + $0x78] sm:$0xff]  ;;  %v306_v1 = vld [vmem:[%s1014_s1 + $0x70] sm:$0xff]  ;;  %vm314_vm0 = vcmask 1041409   ;;  %vm343_vm1 = vcmask 64512   ;;  %s950_s11 = scalar_lea.vmem [#allocation5], %s522_s14 }
  0x2a   : > { %317 = vmatpush.msra.mxu0 %v307_v0  ;;  %v305_v2 = vld [vmem:[%s1014_s1 + $0x68] sm:$0xff]  ;;  %v304_v3 = vld [vmem:[%s1014_s1 + $0x60] sm:$0xff]  ;;  %v303_v6 = vld [vmem:[%s1014_s1 + $0x58] sm:$0xff]  ;;  %s535_s14 = sshll.u32 %s745_s22, 7  ;;  %s438_s22 = sshll.u32 %s950_s11, 4  ;;  %s439_s22 = int_to_ptr.vmem [resolvable:$true] %s438_s22 }
  0x2b   : > { %v835_v4 = vld [vmem:[%s816_s25] sm:$0xff]  ;;  %v838_v5 = vld [vmem:[%s816_s25 + $0x8] sm:$0xff]  ;;  %v844_v7 = vld [vmem:[%s816_s25 + $0x10] sm:$0xff]  ;;  %s437_s13 = scalar_lea.hbm %s1018_s5, %s535_s14  ;;  %s425_s16 = scalar_lea.sflag [#allocation4], %s810_s12 }
  0x2c   : > { %318 = vmatpush.msra.mxu0 %v306_v1  ;;  %v264_v8 = vadd.f32 %v838_v5, %v835_v4  ;;  %v302_v9 = vld [vmem:[%s1014_s1 + $0x50] sm:$0xff]  ;;  %v852_v10 = vld [vmem:[%s816_s25 + $0x18] sm:$0xff]  ;;  %v855_v11 = vld [vmem:[%s816_s25 + $0x40] sm:$0xff]  ;;  %s440_s15 = sshll.u32 %s437_s13, 4  ;;  %s642_s28 = scalar_lea.hbm %s1018_s5, 256  ;;  %s441_s15 = int_to_ptr.hbm [resolvable:$true] %s440_s15 }
  0x2d   : > { %v858_v12 = vld [vmem:[%s816_s25 + $0x48] sm:$0xff]  ;;  %v861_v13 = vld [vmem:[%s816_s25 + $0x50] sm:$0xff]  ;;  %v865_v15 = vld [vmem:[%s816_s25 + $0x20] sm:$0xff]  ;;  %s636_s17 = sshra.s32 %s441_s15, 4  ;;  %s637_s17 = int_to_ptr.hbm [resolvable:$true] %s636_s17 }
  0x2e   : > { %319 = vmatpush.msra.mxu0 %v305_v2  ;;  %v265_v14 = vadd.f32 %v264_v8, %v844_v7  ;;  %v277_v16 = vadd.f32 %v858_v12, %v855_v11  ;;  %v301_v17 = vld [vmem:[%s1014_s1 + $0x48] sm:$0xff]  ;;  %v873_v18 = vld [vmem:[%s816_s25 + $0x58] sm:$0xff]  ;;  %v300_v22 = vld [vmem:[%s1014_s1 + $0x40] sm:$0xff]  ;;  %s638_s26 = scalar_lea.hbm %s637_s17, 128  ;;  %p643_p0 = scmp.lt.s32.totalorder %s637_s17, %s1018_s5 }
  0x2f   : > { %v877_v20 = vld [vmem:[%s816_s25 + $0x28] sm:$0xff]  ;;  %v884_v23 = vld [vmem:[%s816_s25 + $0x60] sm:$0xff]  ;;  %v888_v25 = vld [vmem:[%s816_s25 + $0x30] sm:$0xff]  ;;  %p639_p6 = scmp.ne.s32.totalorder %s637_s17, %s638_s26  ;;  %p644_p1 = scmp.lt.s32.totalorder %s642_s28, %s638_s26 }
  0x30   : > { %320 = vmatpush.msra.mxu0 %v304_v3  ;;  %v266_v19 = vadd.f32 %v265_v14, %v852_v10  ;;  %v278_v21 = vadd.f32 %v277_v16, %v861_v13  ;;  %v299_v27 = vld [vmem:[%s1014_s1 + $0x38] sm:$0xff]  ;;  %v895_v28 = vld [vmem:[%s816_s25 + $0x68] sm:$0xff]  ;;  %v298_v32 = vld [vmem:[%s1014_s1 + $0x30] sm:$0xff] }
  0x31   : > { %v899_v30 = vld [vmem:[%s816_s25 + $0x38] sm:$0xff]  ;;  %v906_v33 = vld [vmem:[%s816_s25 + $0x70] sm:$0xff]  ;;  %v297_v36 = vld [vmem:[%s1014_s1 + $0x28] sm:$0xff]  ;;  %p640_p9 = pnand %p639_p6, %p774_p11  ;;  %p645_p3 = por %p644_p1, %p643_p0 }
  0x32   : > { %321 = vmatpush.msra.mxu0 %v303_v6  ;;  %v267_v24 = vadd.f32 %v266_v19, %v865_v15  ;;  %v279_v26 = vadd.f32 %v278_v21, %v873_v18  ;;  %v914_v37 = vld [vmem:[%s816_s25 + $0x78] sm:$0xff]  ;;  %v296_v40 = vld [vmem:[%s1014_s1 + $0x20] sm:$0xff]  ;;  %v294_v46 = vld [vmem:[%s1014_s1 + $0x10] sm:$0xff] }
  0x33   : > { %v295_v43 = vld [vmem:[%s1014_s1 + $0x18] sm:$0xff]  ;;  %v293_v49 = vld [vmem:[%s1014_s1 + $0x8] sm:$0xff]  ;;  %v292_v52 = vld [vmem:[%s1014_s1] sm:$0xff]  ;;  %p641_p13 = pneg %p640_p9 }
  0x34   : > { %322 = vmatpush.msra.mxu0 %v302_v9  ;;  %v268_v29 = vadd.f32 %v267_v24, %v877_v20  ;;  %v280_v31 = vadd.f32 %v279_v26, %v884_v23  ;;  %v338_v61 = vld [vmem:[%s1016_s3] sm:$0xff] }
  0x35   : > { %362 = vmatpush.msra.mxu1 %v338_v61  ;;  %v586_v62 = vld [vmem:[%s1015_s2] ss:$0 sm:$0xff]  ;;  %p646_p4 = pnand %p645_p3, %p641_p13 }
  0x36   : > { %323 = vmatpush.msra.mxu0 %v301_v17  ;;  %v269_v34 = vadd.f32 %v268_v29, %v888_v25  ;;  %v281_v35 = vadd.f32 %v280_v31, %v895_v28  ;;  %v587_v2 = vld [vmem:[%s1017_s4] ss:$0 sm:$0xff] }
  0x38   : > { %324 = vmatpush.msra.mxu0 %v300_v22  ;;  %v270_v38 = vadd.f32 %v269_v34, %v899_v30  ;;  %v282_v39 = vadd.f32 %v281_v35, %v906_v33 }
  0x3a   : > { %325 = vmatpush.msra.mxu0 %v299_v27  ;;  %v271_v41 = vrot.slane %v270_v38, 4  ;;  %v283_v42 = vadd.f32 %v282_v39, %v914_v37 }
  0x3c   : > { %326 = vmatpush.msra.mxu0 %v298_v32  ;;  %v272_v44 = vadd.f32 %v271_v41, %v270_v38  ;;  %v284_v45 = vrot.slane %v283_v42, 4 }
  0x3e   : > { %327 = vmatpush.msra.mxu0 %v297_v36  ;;  %v273_v47 = vrot.slane %v272_v44, 2  ;;  %v285_v48 = vadd.f32 %v284_v45, %v283_v42 }
  0x40   : > { %328 = vmatpush.msra.mxu0 %v296_v40  ;;  %v274_v50 = vadd.f32 %v273_v47, %v272_v44  ;;  %v286_v51 = vrot.slane %v285_v48, 2 }
  0x42   : > { %329 = vmatpush.msra.mxu0 %v295_v43  ;;  %v275_v53 = vrot.slane %v274_v50, 1  ;;  %v287_v54 = vadd.f32 %v286_v51, %v285_v48 }
  0x44   : > { %330 = vmatpush.msra.mxu0 %v294_v46  ;;  %v276_v55 = vadd.f32 %v275_v53, %v274_v50  ;;  %v288_v56 = vrot.slane %v287_v54, 1 }
  0x46   : > { %331 = vmatpush.msra.mxu0 %v293_v49  ;;  %v289_v57 = vadd.f32 %v288_v56, %v287_v54  ;;  %v290_v58 = vmul.f32 0.015625, %v276_v55 }
  0x48   : > { %332 = vmatpush.msra.mxu0 %v292_v52  ;;  %v291_v59 = vmul.f32 0.015625, %v289_v57 }
  0x4a   : > { %v315_v60 = vsel %vm314_vm0, %v291_v59, %v290_v58 }
  0x4b   : > { %333 = vmatmul.f32.vlgmr.msra.gmra.mxu0 %v315_v60 }
  0xc8   : > { %v334_v63 = vpop.f32.mrf.mxu0 }
  0xc9   : > { %v335_v0 = vadd.f32 %v586_v62, %v334_v63 }
  0xcb   : > { %v337_v1 = vmax.f32 %v335_v0, 0.0 }
  0xcd   : > { %524 = vmatmul.msk.f32.vlgmr.msra.gmra.mxu1 %vm343_vm1, %v337_v1 }
 0x14a   : > { %v364_v3 = vpop.f32.mrf.mxu1 }
 0x14b   : > { %v365_v6 = vadd.f32 %v587_v2, %v364_v3 }
 0x14d   : > { %v525_v8 = vmul.f32 -1.442695, %v365_v6 }
 0x14f   : > { %588 = vpow2.f32 %v525_v8 }
 0x155   : > { %v589_v9 = vpop.eup %588 }
 0x156   : > { %v370_v14 = vadd.f32 1.0, %v589_v9 }
 0x158   : > { %590 = vrcp.f32 %v370_v14  ;;  %v382_v21 = vand.u32 2147483648, %v370_v14  ;;  %v380_v24 = vand.u32 2147483647, %v370_v14  ;;  %vm376_vm3 = vweird.f32 %v370_v14 }
 0x15a   : > { %v383_v27 = vor.u32 1.1754944e-38, %v382_v21  ;;  %vm381_vm5 = vcmp.eq.f32.partialorder %v380_v24, 8.507059e+37 }
 0x15e   : > { %v591_v16 = vpop.eup %590 }
 0x15f   : > { %v372_v17 = vmul.f32 %v591_v16, %v370_v14  ;;  %vm377_vm2 = vweird.f32 %v591_v16 }
 0x160   : > { %vm378_vm4 = vmor %vm376_vm3, %vm377_vm2 }
 0x161   : > { %v373_v19 = vsub.f32 1.0, %v372_v17 }
 0x163   : > { %v374_v22 = vmul.f32 %v591_v16, %v373_v19 }
 0x165   : > { %v375_v26 = vadd.f32 %v591_v16, %v374_v22 }
 0x167   : > { %v379_v29 = vsel %vm378_vm4, %v591_v16, %v375_v26 }
 0x168   : > { %v384_v31 = vsel %vm381_vm5, %v383_v27, %v379_v29 }
 0x169   : > { %v387_v32 = vrot.slane %v384_v31, 1  ;;  %v388_v34 = vperm.slane %v384_v31, 0 }
 0x16b   : > { %v392_v35 = vmul.f32 %v388_v34, %v835_v4  ;;  %v393_v36 = vmul.f32 %v388_v34, %v838_v5  ;;  %v394_v38 = vmul.f32 %v388_v34, %v844_v7  ;;  %v395_v39 = vmul.f32 %v388_v34, %v852_v10 }
 0x16c   : > { %v389_v40 = vperm.slane %v387_v32, 0  ;;  %v396_v41 = vmul.f32 %v388_v34, %v865_v15  ;;  %v397_v4 = vmul.f32 %v388_v34, %v877_v20  ;;  %v398_v5 = vmul.f32 %v388_v34, %v888_v25 }
 0x16d   : > { %408 = vst [vmem:[%s950_s11] sm:$0xff] %v392_v35  ;;  %v399_v7 = vmul.f32 %v388_v34, %v899_v30 }
 0x16e   : > { %409 = vst [vmem:[%s950_s11 + $0x8] sm:$0xff] %v393_v36  ;;  %v400_v10 = vmul.f32 %v389_v40, %v855_v11  ;;  %v401_v15 = vmul.f32 %v389_v40, %v858_v12  ;;  %v402_v20 = vmul.f32 %v389_v40, %v861_v13  ;;  %v403_v25 = vmul.f32 %v389_v40, %v873_v18 }
 0x16f   : > { %410 = vst [vmem:[%s950_s11 + $0x10] sm:$0xff] %v394_v38  ;;  %v404_v11 = vmul.f32 %v389_v40, %v884_v23  ;;  %v405_v12 = vmul.f32 %v389_v40, %v895_v28  ;;  %v406_v13 = vmul.f32 %v389_v40, %v906_v33  ;;  %v407_v30 = vmul.f32 %v389_v40, %v914_v37 }
 0x170   : > { %411 = vst [vmem:[%s950_s11 + $0x18] sm:$0xff] %v395_v39 }
 0x171   : > { %412 = vst [vmem:[%s950_s11 + $0x20] sm:$0xff] %v396_v41 }
 0x172   : > { %413 = vst [vmem:[%s950_s11 + $0x28] sm:$0xff] %v397_v4 }
 0x173   : > { %414 = vst [vmem:[%s950_s11 + $0x30] sm:$0xff] %v398_v5 }
 0x174   : > { %415 = vst [vmem:[%s950_s11 + $0x38] sm:$0xff] %v399_v7 }
 0x175   : > { %416 = vst [vmem:[%s950_s11 + $0x40] sm:$0xff] %v400_v10 }
 0x176   : > { %417 = vst [vmem:[%s950_s11 + $0x48] sm:$0xff] %v401_v15 }
 0x177   : > { %418 = vst [vmem:[%s950_s11 + $0x50] sm:$0xff] %v402_v20 }
 0x178   : > { %419 = vst [vmem:[%s950_s11 + $0x58] sm:$0xff] %v403_v25 }
 0x179   : > { %420 = vst [vmem:[%s950_s11 + $0x60] sm:$0xff] %v404_v11 }
 0x17a   : > { %421 = vst [vmem:[%s950_s11 + $0x68] sm:$0xff] %v405_v12 }
 0x17b   : > { %422 = vst [vmem:[%s950_s11 + $0x70] sm:$0xff] %v406_v13 }
 0x17c   : > { %423 = vst [vmem:[%s950_s11 + $0x78] sm:$0xff] %v407_v30 }
 0x17d   : > { %649 = shalt.err (!%p646_p4)
}
 0x17e   : > { %s692_s12 = smov 128   ;;  %s693_s7 = smov 8  }
 0x17f   : > { %538 = dma.vmem_to_hbm [thread:$0]  (%p774_p11), %s439_s22, 2048, %s441_s15, %s425_s16, %s692_s12, %s692_s12, %s693_s7  }
 0x180 PF: > { %s455_s11 = sand.u32 1, %s676_s18   ;;  %p1024_p7 = scmp.ge.s32.totalorder %s688_s21, 2 }
 0x181   : > { %s456_s14 = scalar_lea.sflag [#allocation4], %s455_s11 }
 0x182   : > { %p545_p5 = pnand %p1024_p7, %p778_p12 }
 0x184   : > { %p546_p8 = pneg %p545_p5 }
 0x186   : > { %671 = dma.done.wait (%p546_p8), %s456_s14, 2048  }
 0x187   : > { %673 = vsyncadd (%p546_p8), %s456_s14, 4294965248  ;;  %p18_p10 = scmp.ge.s32.totalorder %s749_s24, 4   ;;  %s1025_s18 = smov %s680_s19 }
 0x188   : > { %s1026_s19 = smov %s684_s20  ;;  %s1027_s20 = smov %s761_s27 }
 0x189   : > { %s1028_s21 = smov %s749_s24  ;;  %20 = sbr.rel (!%p18_p10) target bundleno = 5 (0x5), region = 85 }
 0x18e   :  { %462 = vsyncpa [#allocation3], 1 }
 0x18f   :  { %464 = vsyncpa [#allocation3 + $0x1], 1 }
 0x190   :  { %465 = vsyncpa [#allocation4], 1 }
 0x191   :  { %467 = vsyncpa [#allocation4 + $0x1], 1 }

</bundles_post_ra>
